<compile_context>
chip_gen: v7x
topology: tpu7x:2x2x1
jax: 0.10.0
libtpu: 0.0.40
codegen_flags: <defaults>
</compile_context>

<pallas_src>
import functools

import jax
import jax.numpy as jnp
from jax import lax
from jax.experimental import pallas as pl
from jax.experimental.pallas import tpu as pltpu


def _softmax_xent_kernel(y_ref, labels_ref, logits_ref, nll_ref, *,
                         inv_temp, fuse_temp):
    y = y_ref[...].astype(jnp.float32)                    # (TB, C)
    tb, c = y.shape

    # ---- softmax(y, dim=1) --------------------------------------------------
    m = jnp.max(y, axis=1, keepdims=True)                 # (TB, 1)
    d = y - m
    e = jnp.exp(d)
    s = jnp.sum(e, axis=1, keepdims=True)
    inv = pl.reciprocal(s, approx=True)                   # EUP slot
    inv = inv * (2.0 - s * inv)                           # Newton step -> ~f32 accuracy
    logits_ref[...] = (e * inv).astype(logits_ref.dtype)

    # ---- per-row NLL of cross_entropy(y / temp, labels) ---------------------
    # Reuse the softmax max (temp > 0): lse(y/t) - y[lbl]/t
    #   = log(sum(exp(d/t))) - d[lbl]/t          (the m/t shift cancels)
    if fuse_temp:
        # temp == 1: the tempered distribution is exactly the softmax pass;
        # skip the second full-width exp (EUP can be the binding slot on v7x).
        st = s
    else:
        # TODO(synk): on v6e/v7x the tempered exp/sum could run in bf16 (~2x
        # EUP rate) since only log(st) is consumed; kept f32 for loss accuracy.
        et = jnp.exp(d * inv_temp)                        # d <= 0 -> et <= 1, stable
        st = jnp.sum(et, axis=1, keepdims=True)           # in [1, C]

    labels = labels_ref[...]                              # (TB, 1) int32
    class_ids = lax.broadcasted_iota(jnp.int32, (tb, c), 1)
    picked_d = jnp.sum(jnp.where(class_ids == labels, d, 0.0),
                       axis=1, keepdims=True)             # (TB, 1)

    # TODO(synk): F.cross_entropy's ignore_index=-100 is not handled (such rows
    # would still contribute lse to the mean here).
    nll_ref[...] = jnp.log(st) - picked_d * inv_temp


def _vmem_policy():
    """(double-buffered tile budget, vmem_limit_bytes), per TPU generation."""
    try:
        cap = int(getattr(pltpu.get_tpu_info(), "vmem_capacity_bytes", 0))
    except Exception:                       # query unavailable -> be conservative
        cap = 0
    if cap >= (100 << 20):                  # v5e / v6e: 128 MiB physical VMEM
        return 26 << 20, 64 << 20
    # v7x (64 MiB physical, 32 MiB scoped default) or unknown: stay conservative.
    return 18 << 20, 48 << 20


def _choose_block_rows(B, C, in_itemsize, out_itemsize, sublane, budget_bytes):
    """Biggest batch tile (rows) whose double-buffered VMEM fits budget_bytes.

    Per batch row the pipeline holds, double-buffered: the y and logits tiles
    (lane-dense, C*itemsize each) plus the (TB,1) labels/nll blocks whose lane
    dim pads to 128 (512 B/row each).  Bytes are the only cap — no row cap.
    """
    per_row = 2 * (C * (in_itemsize + out_itemsize) + 2 * 512)
    tb = budget_bytes // max(per_row, 1)
    if B <= sublane:
        return B                            # single full-extent block ((8,128) rule OK)
    # Keep the "parallel" batch axis splittable across v7x's two TensorCores.
    tb = min(tb, -(-B // 2))                # <= ceil(B/2) -> grid has >= 2 steps
    tb = max((int(tb) // sublane) * sublane, sublane)
    return min(tb, B)


class SoftmaxPallas:
    """JAX/Pallas equivalent of the PyTorch Softmax loss module."""

    def __init__(self, **options):
        self.temp = float(options["temp"])
        assert self.temp > 0.0, "temperature must be positive"
        # Optional override, mainly to exercise multi-tile grids in tests.
        self.block_rows = options.get("block_rows", None)

    def __call__(self, x, y, labels=None):
        # x is unused (matches the PyTorch module's forward signature).
        if labels is None:
            # Spec parity: PyTorch module returns the *raw* y here, not softmax(y).
            return (y, 0)

        B, C = y.shape
        labels2d = labels.astype(jnp.int32).reshape(B, 1)

        in_bytes = jnp.dtype(y.dtype).itemsize
        out_bytes = in_bytes                               # logits in input dtype
        sublane = max(8, 32 // max(in_bytes, 1))           # f32:8, bf16:16, int8/fp8:32
        budget, vmem_limit = _vmem_policy()

        # Guard huge C: the minimum (one sublane-group of rows) tile must fit.
        # TODO(synk): add a class-axis ("arbitrary") grid with online-softmax
        # running max/sum for C large enough that one row-tile blows VMEM.
        min_tile_bytes = 2 * sublane * C * (in_bytes + out_bytes)
        if min_tile_bytes > vmem_limit - (8 << 20):
            raise NotImplementedError(
                f"C={C} too large for a single class-axis block "
                f"({min_tile_bytes >> 20} MiB double-buffered); needs class tiling.")

        tb = self.block_rows or _choose_block_rows(
            B, C, in_bytes, out_bytes, sublane, budget)
        tb = min(tb, B)
        grid = pl.cdiv(B, tb)

        fuse_temp = (self.temp == 1.0)
        kernel = functools.partial(_softmax_xent_kernel,
                                   inv_temp=1.0 / self.temp,
                                   fuse_temp=fuse_temp)
        cost = pl.CostEstimate(
            flops=7 * B * C,
            transcendentals=(1 if fuse_temp else 2) * B * C,
            bytes_accessed=B * C * (in_bytes + out_bytes) + 8 * B,
        )

        logits, nll = pl.pallas_call(
            kernel,
            out_shape=(
                jax.ShapeDtypeStruct((B, C), y.dtype),         # logits in input dtype
                jax.ShapeDtypeStruct((B, 1), jnp.float32),      # per-row NLL
            ),
            grid_spec=pltpu.PrefetchScalarGridSpec(
                num_scalar_prefetch=0,
                grid=(grid,),
                in_specs=[
                    pl.BlockSpec((tb, C), lambda i: (i, 0)),
                    pl.BlockSpec((tb, 1), lambda i: (i, 0)),
                ],
                out_specs=[
                    pl.BlockSpec((tb, C), lambda i: (i, 0)),
                    pl.BlockSpec((tb, 1), lambda i: (i, 0)),
                ],
            ),
            compiler_params=pltpu.CompilerParams(
                dimension_semantics=("parallel",),              # no cross-tile state
                vmem_limit_bytes=vmem_limit,
            ),
            cost_estimate=cost,
        )(y, labels2d)

        # Tiny final reduction in plain JAX (keeps the grid axis parallel).
        loss = jnp.sum(nll) / jnp.float32(B)
        return (logits, loss)


def _reference(y, labels, temp):
    ref_logits = jax.nn.softmax(y.astype(jnp.float32), axis=1)
    yt = y.astype(jnp.float32) / temp
    picked = jnp.take_along_axis(yt, labels[:, None], axis=1)[:, 0]
    ref_loss = jnp.mean(jax.nn.logsumexp(yt, axis=1) - picked)
    return ref_logits, ref_loss


if __name__ == "__main__":
    key = jax.random.PRNGKey(0)
    k_x, k_y, k_lbl, k_y2, k_lbl2 = jax.random.split(key, 5)

    # --- case 1: single-tile path, temp != 1 ---------------------------------
    B, C = 8, 32
    x = jax.random.normal(k_x, (B, 64), dtype=jnp.float32)      # unused feature input
    y = jax.random.normal(k_y, (B, C), dtype=jnp.float32)       # raw logits
    labels = jax.random.randint(k_lbl, (B,), 0, C, dtype=jnp.int32)

    module = SoftmaxPallas(temp=2.0)

    out_no_labels, zero = module(x, y, labels=None)              # passthrough path
    jax.block_until_ready(out_no_labels)
    assert zero == 0

    logits, loss = module(x, y, labels)
    jax.block_until_ready((logits, loss))
    ref_logits, ref_loss = _reference(y, labels, 2.0)
    assert jnp.allclose(logits, ref_logits, atol=1e-5, rtol=1e-5)
    assert jnp.allclose(loss, ref_loss, atol=1e-5, rtol=1e-5)

    # --- case 2: multi-tile grid with a partial last tile --------------------
    B2 = 20
    y2 = jax.random.normal(k_y2, (B2, C), dtype=jnp.float32)
    labels2 = jax.random.randint(k_lbl2, (B2,), 0, C, dtype=jnp.int32)
    module_tiled = SoftmaxPallas(temp=2.0, block_rows=8)         # grid = 3, last tile masked
    logits2, loss2 = module_tiled(x, y2, labels2)
    jax.block_until_ready((logits2, loss2))
    ref_logits2, ref_loss2 = _reference(y2, labels2, 2.0)
    assert jnp.allclose(logits2, ref_logits2, atol=1e-5, rtol=1e-5)
    assert jnp.allclose(loss2, ref_loss2, atol=1e-5, rtol=1e-5)

    # --- case 3: temp == 1 fused path (single exp per element) ---------------
    module_t1 = SoftmaxPallas(temp=1.0)
    logits3, loss3 = module_t1(x, y2, labels2)
    jax.block_until_ready((logits3, loss3))
    ref_logits3, ref_loss3 = _reference(y2, labels2, 1.0)
    assert jnp.allclose(logits3, ref_logits3, atol=1e-5, rtol=1e-5)
    assert jnp.allclose(loss3, ref_loss3, atol=1e-5, rtol=1e-5)

    print("KERNEL_OK")
</pallas_src>

<mosaic_0001>
module attributes {stable_mosaic.version = 11 : i64} {
  func.func @_softmax_xent_kernel(%arg0: i32, %arg1: memref<8x32xf32, #tpu.memory_space<vmem>>, %arg2: memref<8x1xi32, #tpu.memory_space<vmem>>, %arg3: memref<8x32xf32, #tpu.memory_space<vmem>>, %arg4: memref<8x1xf32, #tpu.memory_space<vmem>>) attributes {dimension_semantics = [#tpu.dimension_semantics<parallel>], iteration_bounds = array<i64: 1>, scalar_prefetch = 0 : i64, scratch_operands = 0 : i64, tpu.core_type = #tpu.core_type<tc>, window_params = [{transform_indices = @transform_0, window_bounds = array<i64: 8, 32>}, {transform_indices = @transform_1, window_bounds = array<i64: 8, 1>}, {transform_indices = @transform_2, window_bounds = array<i64: 8, 32>}, {transform_indices = @transform_3, window_bounds = array<i64: 8, 1>}]} {
    %c0 = arith.constant 0 : index
    %c0_0 = arith.constant 0 : index
    %0 = vector.load %arg1[%c0, %c0_0] : memref<8x32xf32, #tpu.memory_space<vmem>>, vector<8x32xf32>
    %cst = arith.constant dense<0xFF800000> : vector<8xf32>
    %1 = vector.multi_reduction <maximumf>, %0, %cst [1] : vector<8x32xf32> to vector<8xf32>
    %2 = vector.shape_cast %1 : vector<8xf32> to vector<8x1xf32>
    %3 = vector.broadcast %2 : vector<8x1xf32> to vector<8x32xf32>
    %4 = arith.subf %0, %3 : vector<8x32xf32>
    %5 = math.exp %4 : vector<8x32xf32>
    %cst_1 = arith.constant dense<0.000000e+00> : vector<8xf32>
    %6 = vector.multi_reduction <add>, %5, %cst_1 [1] : vector<8x32xf32> to vector<8xf32>
    %7 = vector.shape_cast %6 : vector<8xf32> to vector<8x1xf32>
    %8 = tpu.reciprocal %7 {approx = true} : vector<8x1xf32> -> vector<8x1xf32>
    %9 = arith.mulf %7, %8 : vector<8x1xf32>
    %cst_2 = arith.constant 2.000000e+00 : f32
    %10 = vector.broadcast %cst_2 : f32 to vector<8x1xf32>
    %11 = arith.subf %10, %9 : vector<8x1xf32>
    %12 = arith.mulf %8, %11 : vector<8x1xf32>
    %13 = vector.broadcast %12 : vector<8x1xf32> to vector<8x32xf32>
    %14 = arith.mulf %5, %13 : vector<8x32xf32>
    %c0_3 = arith.constant 0 : index
    %c0_4 = arith.constant 0 : index
    %15 = vector.load %arg3[%c0_3, %c0_4] : memref<8x32xf32, #tpu.memory_space<vmem>>, vector<8x32xf32>
    tpu.vector_store %arg3[%c0_3, %c0_4], %14 {strides = array<i32>} : memref<8x32xf32, #tpu.memory_space<vmem>>, vector<8x32xf32>,
    %cst_5 = arith.constant 5.000000e-01 : f32
    %16 = vector.broadcast %cst_5 : f32 to vector<8x32xf32>
    %17 = arith.mulf %4, %16 : vector<8x32xf32>
    %18 = math.exp %17 : vector<8x32xf32>
    %cst_6 = arith.constant dense<0.000000e+00> : vector<8xf32>
    %19 = vector.multi_reduction <add>, %18, %cst_6 [1] : vector<8x32xf32> to vector<8xf32>
    %20 = vector.shape_cast %19 : vector<8xf32> to vector<8x1xf32>
    %c0_7 = arith.constant 0 : index
    %c0_8 = arith.constant 0 : index
    %21 = vector.load %arg2[%c0_7, %c0_8] : memref<8x1xi32, #tpu.memory_space<vmem>>, vector<8x1xi32>
    %22 = tpu.iota {dimensions = array<i32: 1>} : vector<8x32xi32>
    %23 = vector.broadcast %21 : vector<8x1xi32> to vector<8x32xi32>
    %24 = arith.cmpi eq, %22, %23 : vector<8x32xi32>
    %cst_9 = arith.constant 0.000000e+00 : f32
    %25 = vector.broadcast %cst_9 : f32 to vector<8x32xf32>
    %26 = arith.select %24, %4, %25 : vector<8x32xi1>, vector<8x32xf32>
    %cst_10 = arith.constant dense<0.000000e+00> : vector<8xf32>
    %27 = vector.multi_reduction <add>, %26, %cst_10 [1] : vector<8x32xf32> to vector<8xf32>
    %28 = vector.shape_cast %27 : vector<8xf32> to vector<8x1xf32>
    %29 = math.log %20 : vector<8x1xf32>
    %cst_11 = arith.constant 5.000000e-01 : f32
    %30 = vector.broadcast %cst_11 : f32 to vector<8x1xf32>
    %31 = arith.mulf %28, %30 : vector<8x1xf32>
    %32 = arith.subf %29, %31 : vector<8x1xf32>
    %c0_12 = arith.constant 0 : index
    %c0_13 = arith.constant 0 : index
    %33 = vector.load %arg4[%c0_12, %c0_13] : memref<8x1xf32, #tpu.memory_space<vmem>>, vector<8x1xf32>
    tpu.vector_store %arg4[%c0_12, %c0_13], %32 {strides = array<i32>} : memref<8x1xf32, #tpu.memory_space<vmem>>, vector<8x1xf32>,
    return
  }
  func.func @transform_0(%arg0: i32) -> (i32, i32) {
    %c0_i32 = arith.constant 0 : i32
    %c0_i32_0 = arith.constant 0 : i32
    return %arg0, %c0_i32 : i32, i32
  }
  func.func @transform_1(%arg0: i32) -> (i32, i32) {
    %c0_i32 = arith.constant 0 : i32
    %c0_i32_0 = arith.constant 0 : i32
    return %arg0, %c0_i32 : i32, i32
  }
  func.func @transform_2(%arg0: i32) -> (i32, i32) {
    %c0_i32 = arith.constant 0 : i32
    %c0_i32_0 = arith.constant 0 : i32
    return %arg0, %c0_i32 : i32, i32
  }
  func.func @transform_3(%arg0: i32) -> (i32, i32) {
    %c0_i32 = arith.constant 0 : i32
    %c0_i32_0 = arith.constant 0 : i32
    return %arg0, %c0_i32 : i32, i32
  }
}

</mosaic_0001>

<bundles_post_ra>
// kernel: tpu_custom_call.1
= control target key start
LH: loop header
LB: loop body
LE: loop exit
PB: predicated region body
PF: predicated region fallthrough
CT: control target
= control target key end

     0   :  { %vm15_vm0 = vcmask 261120   ;;  %s155_s0 = inlined_call_operand.vmem [shape: f32[8,32], index: 0, kind: input, shape index: {}]   ;;  %s156_s1 = inlined_call_operand.vmem [shape: s32[8,1], index: 1, kind: input, shape index: {}]   ;;  %s157_s2 = inlined_call_operand.hbm [shape: f32[8,32], index: 2, kind: output, shape index: {0}]   ;;  %s158_s3 = inlined_call_operand.vmem [shape: f32[8,1], index: 3, kind: output, shape index: {1}]  }
   0x1   :  { %v14_v0 = vld [vmem:[%s155_s0] sm:$0xff] }
   0x2   :  { %9 = vsyncpa [#allocation3], 0  ;;  %v16_v1 = vsel %vm15_vm0, %v14_v0, -inf  ;;  %v107_v2 = vmov 0   ;;  %v37_v3 = vld [vmem:[%s156_s1] sm:$0xff]  ;;  %v38_v9 = vlaneseq  ;;  %s108_s0 = smov [#allocation2]  }
   0x3   :  { %74 = vset.pattern.permute.xlu0 %v107_v2  ;;  %s60_s1 = sshll.u32 %s108_s0, 4  ;;  %vm52_vm2 = vcmask 7168   ;;  %s61_s1 = int_to_ptr.vmem [resolvable:$true] %s60_s1 }
   0x4   :  { %17 = vmax.xlane.f32.xlu0 %v16_v1  ;;  %v39_v10 = vand.u32 127, %v38_v9  ;;  %s83_s18 = scalar_lea.vmem %s61_s1, 128  ;;  %p88_p1 = scmp.lt.s32.totalorder %s61_s1, %s61_s1 }
   0x5   :  { %p84_p0 = scmp.ne.s32.totalorder %s61_s1, %s83_s18  ;;  %p89_p2 = scmp.lt.s32.totalorder %s83_s18, %s83_s18 }
   0x7   :  { %p90_p3 = por %p89_p2, %p88_p1 }
   0x9   :  { %p91_p4 = pnand %p90_p3, %p84_p0 }
  0x1a   :  { %41 = vperm.xlu0 %74, %v37_v3  }
  0x91   :  { %v18_v4 = vpop.xlane.xlu0 %17 }
  0x92   :  { %v19_v5 = vsub.f32 %v14_v0, %v18_v4 }
  0x94   :  { %v20_v6 = vmul.f32 1.442695, %v19_v5  ;;  %v31_v7 = vmul.f32 0.5, %v19_v5 }
  0x96   :  { %75 = vpow2.f32 %v20_v6  ;;  %v32_v8 = vmul.f32 1.442695, %v31_v7 }
  0x98   :  { %77 = vpow2.f32 %v32_v8 }
  0x99   :  { %v42_v12 = vpop.permute.xlu0 %41 }
  0x9a   :  { %vm43_vm1 = vcmp.eq.s32.totalorder %v39_v10, %v42_v12 }
  0x9b   :  { %v44_v16 = vsel %vm43_vm1, %v19_v5, 0.0 }
  0x9c   :  { %v45_v17 = vsel %vm15_vm0, %v44_v16, 0.0 }
  0xa0   :  { %v76_v11 = vpop.eup %75 }
  0xa1   :  { %v22_v13 = vsel %vm15_vm0, %v76_v11, 0.0 }
  0xa2   :  { %v78_v14 = vpop.eup %77  ;;  %23 = vadd.xlane.f32.xlu1 %v22_v13 }
  0xa3   :  { %v34_v15 = vsel %vm15_vm0, %v78_v14, 0.0 }
  0xa6   :  { %35 = vadd.xlane.f32.xlu1 %v34_v15 }
  0xaa   :  { %46 = vadd.xlane.f32.xlu1 %v45_v17 }
 0x12f   :  { %v24_v18 = vpop.xlane.xlu1 %23 }
 0x130   :  { %79 = vrcp.f32 %v24_v18 }
 0x133   :  { %v36_v19 = vpop.xlane.xlu1 %35 }
 0x134   :  { %81 = vlog2.f32 %v36_v19 }
 0x137   :  { %v47_v22 = vpop.xlane.xlu1 %46 }
 0x138   :  { %v50_v27 = vmul.f32 0.5, %v47_v22 }
 0x13a   :  { %v80_v20 = vpop.eup %79 }
 0x13b   :  { %v26_v21 = vmul.f32 %v80_v20, %v24_v18 }
 0x13d   :  { %v27_v23 = vsub.f32 2.0, %v26_v21 }
 0x13e   :  { %v82_v24 = vpop.eup %81 }
 0x13f   :  { %v28_v25 = vmul.f32 %v80_v20, %v27_v23  ;;  %v49_v26 = vmul.f32 0.6931472, %v82_v24 }
 0x141   :  { %v51_v28 = vsub.f32 %v49_v26, %v50_v27  ;;  %v29_v29 = vmul.f32 %v76_v11, %v28_v25 }
 0x143   :  { %53 = vst.msk [vmem:[%s158_s3] sm:$0xff] %vm52_vm2, %v51_v28 }
 0x144   :  { %30 = vst.msk [vmem:[#allocation2] sm:$0xff] %vm15_vm0, %v29_v29 }
 0x145   :  { %94 = shalt.err (!%p91_p4)
}
 0x146   :  { %s95_s21 = scalar_lea.hbm %s157_s2, 128 }
 0x147   :  { %p96_p5 = scmp.ne.s32.totalorder %s157_s2, %s95_s21  ;;  %p99_p6 = scmp.lt.u32.totalorder %s95_s21, %s157_s2 }
 0x149   :  { %p101_p7 = pnand %p99_p6, %p96_p5 }
 0x14b   :  { %104 = shalt.err (!%p101_p7)
}
 0x14c   :  { %63 = dma.vmem_to_hbm [thread:$0]  %s61_s1, 128, %s157_s2, [#allocation3]  }
 0x14d   :  { %105 = dma.done.wait [#allocation3], 128  }
 0x14e   :  { %106 = vsyncadd [#allocation3], 4294967168 }
 0x14f   :  { %71 = vsyncpa [#allocation3], 1 }

</bundles_post_ra>
